<compile_context>
chip_gen: v5e
topology: v5e:2x2
jax: 0.10.0
libtpu: 0.0.40
codegen_flags: <defaults>
</compile_context>

<pallas_src>
import jax
import jax.numpy as jnp
from jax.experimental import pallas as pl
from jax.experimental.pallas import tpu as pltpu

OUT_PAD = 128  # lane-dense padded output width


def nsp_kernel(x_ref, w_ref, b_ref, o_ref):
    # x: (TB, D), w: (D, OUT_PAD) in compute dtype, b: (1, OUT_PAD) f32.
    acc = jnp.dot(x_ref[...], w_ref[...], preferred_element_type=jnp.float32)
    o_ref[...] = (acc + b_ref[...]).astype(o_ref.dtype)


def _round_up(x, m):
    return ((x + m - 1) // m) * m


def next_sentence_pred(x, weight, bias, *, block_rows=1024):
    """Forward pass of NextSentencePred (nn.LazyLinear(2)).

    x      : (..., D) input in its native dtype (f32 or bf16).
    weight : (2, D)   PyTorch nn.Linear layout (out_features, in_features).
    bias   : (2,).
    Returns: (..., 2) logits in x.dtype.
    """
    orig_shape = x.shape
    D = orig_shape[-1]
    out_f = weight.shape[0]

    x2 = x.reshape(-1, D)          # keep native dtype -- no f32 upcast
    B = x2.shape[0]
    cdt = x2.dtype

    # Zero-pad weight to 128 output lanes in the compute dtype (lane-dense
    # stores, full MXU N tile).  Bias stays f32 and is added post-accumulate.
    w_p = jnp.zeros((D, OUT_PAD), cdt).at[:, :out_f].set(weight.T.astype(cdt))
    b_p = jnp.zeros((1, OUT_PAD), jnp.float32).at[:, :out_f].set(
        bias.astype(jnp.float32))

    # Rows per grid step: multiple of 8 sublanes; aim for >=2 tiles so the
    # "parallel" axis can shard across v7x's two TensorCores; cap for VMEM.
    if B <= 8:
        tb = 8
    else:
        tb = min(block_rows, _round_up(pl.cdiv(B, 2), 8))
    grid = (pl.cdiv(B, tb),)   # ragged last block handled by Pallas masking

    out = pl.pallas_call(
        nsp_kernel,
        out_shape=jax.ShapeDtypeStruct((B, OUT_PAD), cdt),
        grid_spec=pltpu.PrefetchScalarGridSpec(
            num_scalar_prefetch=0,
            grid=grid,
            in_specs=[
                pl.BlockSpec((tb, D), lambda i: (i, 0)),        # row tile of X
                pl.BlockSpec((D, OUT_PAD), lambda i: (0, 0)),   # padded weight
                pl.BlockSpec((1, OUT_PAD), lambda i: (0, 0)),   # padded bias
            ],
            out_specs=pl.BlockSpec((tb, OUT_PAD), lambda i: (i, 0)),
        ),
        compiler_params=pltpu.CompilerParams(
            dimension_semantics=("parallel",),
            vmem_limit_bytes=32 * 1024 * 1024,
        ),
    )(x2, w_p, b_p)

    return out[:, :out_f].reshape(*orig_shape[:-1], out_f)


def next_sentence_pred_ref(x, weight, bias):
    """Pure-JAX f32 reference mirroring nn.Linear(out_features=2)."""
    return (x.astype(jnp.float32) @ weight.T.astype(jnp.float32)
            + bias.astype(jnp.float32))


if __name__ == "__main__":
    key = jax.random.PRNGKey(0)
    k1, k2, k3, k4, k5 = jax.random.split(key, 5)

    # Case 1: classic NSP input -- (batch, num_hiddens) = (2, 128), f32.
    B, D = 2, 128
    x = jax.random.normal(k1, (B, D), dtype=jnp.float32)
    weight = jax.random.normal(k2, (2, D), dtype=jnp.float32) * (1.0 / jnp.sqrt(D))
    bias = jax.random.normal(k3, (2,), dtype=jnp.float32) * 0.1

    out = jax.block_until_ready(next_sentence_pred(x, weight, bias))
    ref = next_sentence_pred_ref(x, weight, bias)
    assert out.shape == (B, 2)
    assert jnp.allclose(out, ref, atol=1e-3, rtol=1e-3), "mismatch vs reference (2D f32)"

    # Case 2: arbitrary leading dims (LazyLinear applies to the last dim), f32.
    B2, S2, D2 = 2, 8, 32
    x2 = jax.random.normal(k4, (B2, S2, D2), dtype=jnp.float32)
    weight2 = jax.random.normal(k2, (2, D2), dtype=jnp.float32) * (1.0 / jnp.sqrt(D2))
    bias2 = jax.random.normal(k3, (2,), dtype=jnp.float32) * 0.1

    out2 = jax.block_until_ready(next_sentence_pred(x2, weight2, bias2))
    ref2 = next_sentence_pred_ref(x2, weight2, bias2)
    assert out2.shape == (B2, S2, 2)
    assert jnp.allclose(out2, ref2, atol=1e-3, rtol=1e-3), "mismatch vs reference (3D f32)"

    # Case 3: bf16 activations (native BERT dtype) -- kernel stays in bf16,
    # f32 MXU accumulate; compare against the f32 reference with looser tol.
    B3, D3 = 16, 64
    x3 = jax.random.normal(k5, (B3, D3), dtype=jnp.float32).astype(jnp.bfloat16)
    weight3 = jax.random.normal(k2, (2, D3), dtype=jnp.float32) * (1.0 / jnp.sqrt(D3))
    bias3 = jax.random.normal(k3, (2,), dtype=jnp.float32) * 0.1

    out3 = jax.block_until_ready(next_sentence_pred(x3, weight3, bias3))
    ref3 = next_sentence_pred_ref(x3, weight3, bias3)
    assert out3.shape == (B3, 2)
    assert out3.dtype == jnp.bfloat16
    assert jnp.allclose(out3.astype(jnp.float32), ref3, atol=3e-2, rtol=3e-2), \
        "mismatch vs reference (bf16)"

    print("KERNEL_OK")
</pallas_src>

<mosaic_0001>
module attributes {stable_mosaic.version = 11 : i64} {
  func.func @nsp_kernel(%arg0: i32, %arg1: memref<8x128xf32, #tpu.memory_space<vmem>>, %arg2: memref<128x128xf32, #tpu.memory_space<vmem>>, %arg3: memref<1x128xf32, #tpu.memory_space<vmem>>, %arg4: memref<8x128xf32, #tpu.memory_space<vmem>>) attributes {dimension_semantics = [#tpu.dimension_semantics<parallel>], iteration_bounds = array<i64: 1>, scalar_prefetch = 0 : i64, scratch_operands = 0 : i64, tpu.core_type = #tpu.core_type<tc>, window_params = [{transform_indices = @transform_0, window_bounds = array<i64: 8, 128>}, {pipeline_mode = #tpu.pipeline_mode<synchronous>, transform_indices = @transform_1, window_bounds = array<i64: 128, 128>}, {pipeline_mode = #tpu.pipeline_mode<synchronous>, transform_indices = @transform_2, window_bounds = array<i64: 1, 128>}, {transform_indices = @transform_3, window_bounds = array<i64: 8, 128>}]} {
    %c0 = arith.constant 0 : index
    %c0_0 = arith.constant 0 : index
    %0 = vector.load %arg1[%c0, %c0_0] : memref<8x128xf32, #tpu.memory_space<vmem>>, vector<8x128xf32>
    %c0_1 = arith.constant 0 : index
    %c0_2 = arith.constant 0 : index
    %1 = vector.load %arg2[%c0_1, %c0_2] : memref<128x128xf32, #tpu.memory_space<vmem>>, vector<128x128xf32>
    %cst = arith.constant dense<0.000000e+00> : vector<8x128xf32>
    %2 = tpu.matmul %0, %1, %cst {dimension_numbers = #tpu.dot_dimension_numbers<[1], [0], [0], [1], [0, 0, 1, 1], [], []>} : vector<8x128xf32>, vector<128x128xf32>, vector<8x128xf32> -> vector<8x128xf32>
    %c0_3 = arith.constant 0 : index
    %c0_4 = arith.constant 0 : index
    %3 = vector.load %arg3[%c0_3, %c0_4] : memref<1x128xf32, #tpu.memory_space<vmem>>, vector<1x128xf32>
    %4 = vector.broadcast %3 : vector<1x128xf32> to vector<8x128xf32>
    %5 = arith.addf %2, %4 : vector<8x128xf32>
    %c0_5 = arith.constant 0 : index
    %c0_6 = arith.constant 0 : index
    %6 = vector.load %arg4[%c0_5, %c0_6] : memref<8x128xf32, #tpu.memory_space<vmem>>, vector<8x128xf32>
    tpu.vector_store %arg4[%c0_5, %c0_6], %5 {strides = array<i32>} : memref<8x128xf32, #tpu.memory_space<vmem>>, vector<8x128xf32>,
    return
  }
  func.func @transform_0(%arg0: i32) -> (i32, i32) {
    %c0_i32 = arith.constant 0 : i32
    %c0_i32_0 = arith.constant 0 : i32
    return %arg0, %c0_i32 : i32, i32
  }
  func.func @transform_1(%arg0: i32) -> (i32, i32) {
    %c0_i32 = arith.constant 0 : i32
    %c0_i32_0 = arith.constant 0 : i32
    %c0_i32_1 = arith.constant 0 : i32
    return %c0_i32, %c0_i32_0 : i32, i32
  }
  func.func @transform_2(%arg0: i32) -> (i32, i32) {
    %c0_i32 = arith.constant 0 : i32
    %c0_i32_0 = arith.constant 0 : i32
    %c0_i32_1 = arith.constant 0 : i32
    return %c0_i32, %c0_i32_0 : i32, i32
  }
  func.func @transform_3(%arg0: i32) -> (i32, i32) {
    %c0_i32 = arith.constant 0 : i32
    %c0_i32_0 = arith.constant 0 : i32
    return %arg0, %c0_i32 : i32, i32
  }
}

</mosaic_0001>

<bundles_post_ra>
// kernel: tpu_custom_call.1
= control target key start
LH: loop header
LB: loop body
LE: loop exit
PB: predicated region body
PF: predicated region fallthrough
CT: control target
= control target key end

     0   :  { %8 = vsyncpa [#allocation3], 0  ;;  %s240_s0 = inlined_call_operand.hbm [shape: f32[2,128], index: 0, kind: input, shape index: {}]   ;;  %s241_s1 = inlined_call_operand.hbm [shape: f32[128,128], index: 1, kind: input, shape index: {}]   ;;  %s242_s2 = inlined_call_operand.vmem [shape: f32[1,128], index: 2, kind: input, shape index: {}]   ;;  %s243_s3 = inlined_call_operand.hbm [shape: f32[2,128], index: 3, kind: output, shape index: {}]  }
   0x1   :  { %9 = vsyncpa [#allocation6], 0 }
   0x2   :  { %10 = vsyncpa [#allocation4], 0 }
   0x3   :  { %14 = vsyncadd [#allocation3], 96  ;;  %s15_s14 = sshll.u32 %s240_s0, 4  ;;  %s195_s15 = smov [#allocation2]   ;;  %s16_s14 = int_to_ptr.hbm [resolvable:$true] %s15_s14 }
   0x4   :  { %s17_s16 = sshll.u32 %s195_s15, 4  ;;  %s28_s19 = sshll.u32 %s241_s1, 4  ;;  %s18_s16 = int_to_ptr.vmem [resolvable:$true] %s17_s16  ;;  %s29_s19 = int_to_ptr.hbm [resolvable:$true] %s28_s19 }
   0x5   :  { %s196_s20 = smov 32   ;;  %s197_s21 = smov 2  }
   0x6   :  { %23 = dma.hbm_to_vmem [thread:$0]  %s16_s14, 32, %s18_s16, [#allocation3], %s196_s20, %s196_s20, %s197_s21  }
   0x7   :  { %s198_s22 = smov [#allocation5]   ;;  %s199_s24 = smov 128  }
   0x8   :  { %s30_s23 = sshll.u32 %s198_s22, 4  ;;  %s200_s0 = smov 8   ;;  %s31_s23 = int_to_ptr.vmem [resolvable:$true] %s30_s23 }
   0x9   :  { %36 = dma.hbm_to_vmem [thread:$0]  %s29_s19, 2048, %s31_s23, [#allocation6], %s199_s24, %s199_s24, %s200_s0  }
   0xa   :  { %189 = dma.done.wait [#allocation3], 128  }
   0xb   :  { %190 = vsyncadd [#allocation3], 4294967168 }
   0xc   :  { %191 = dma.done.wait [#allocation6], 2048  }
   0xd   :  { %192 = vsyncadd [#allocation6], 4294965248  ;;  %v63_v0 = vld [vmem:[#allocation5 + $0x78] sm:$0xff]  ;;  %v62_v1 = vld [vmem:[#allocation5 + $0x70] sm:$0xff] }
   0xe   :  { %68 = vmatpush.msra.mxu0 %v63_v0  ;;  %v61_v2 = vld [vmem:[#allocation5 + $0x68] sm:$0xff]  ;;  %v60_v3 = vld [vmem:[#allocation5 + $0x60] sm:$0xff]  ;;  %v59_v4 = vld [vmem:[#allocation5 + $0x58] sm:$0xff] }
   0xf   :  { %v58_v5 = vld [vmem:[#allocation5 + $0x50] sm:$0xff]  ;;  %v57_v6 = vld [vmem:[#allocation5 + $0x48] sm:$0xff]  ;;  %v56_v7 = vld [vmem:[#allocation5 + $0x40] sm:$0xff] }
  0x10   :  { %69 = vmatpush.msra.mxu0 %v62_v1  ;;  %v55_v8 = vld [vmem:[#allocation5 + $0x38] sm:$0xff]  ;;  %v54_v9 = vld [vmem:[#allocation5 + $0x30] sm:$0xff]  ;;  %v53_v10 = vld [vmem:[#allocation5 + $0x28] sm:$0xff] }
  0x11   :  { %v52_v11 = vld [vmem:[#allocation5 + $0x20] sm:$0xff]  ;;  %v51_v12 = vld [vmem:[#allocation5 + $0x18] sm:$0xff]  ;;  %v50_v13 = vld [vmem:[#allocation5 + $0x10] sm:$0xff] }
  0x12   :  { %70 = vmatpush.msra.mxu0 %v61_v2  ;;  %v49_v14 = vld [vmem:[#allocation5 + $0x8] sm:$0xff]  ;;  %v48_v15 = vld [vmem:[#allocation5] sm:$0xff]  ;;  %v47_v16 = vld [vmem:[#allocation2] sm:$0xff] }
  0x13   :  { %v116_v17 = vld [vmem:[%s242_s2] ss:$0 sm:$0xff] }
  0x14   :  { %71 = vmatpush.msra.mxu0 %v60_v3 }
  0x16   :  { %72 = vmatpush.msra.mxu0 %v59_v4 }
  0x18   :  { %73 = vmatpush.msra.mxu0 %v58_v5 }
  0x1a   :  { %74 = vmatpush.msra.mxu0 %v57_v6 }
  0x1c   :  { %75 = vmatpush.msra.mxu0 %v56_v7 }
  0x1e   :  { %76 = vmatpush.msra.mxu0 %v55_v8 }
  0x20   :  { %77 = vmatpush.msra.mxu0 %v54_v9 }
  0x22   :  { %78 = vmatpush.msra.mxu0 %v53_v10 }
  0x24   :  { %79 = vmatpush.msra.mxu0 %v52_v11 }
  0x26   :  { %80 = vmatpush.msra.mxu0 %v51_v12 }
  0x28   :  { %81 = vmatpush.msra.mxu0 %v50_v13 }
  0x2a   :  { %82 = vmatpush.msra.mxu0 %v49_v14 }
  0x2c   :  { %83 = vmatpush.msra.mxu0 %v48_v15 }
  0x2d   :  { %84 = vmatmul.f32.vlgmr.msra.gmra.mxu0 %v47_v16 }
  0xaa   :  { %v85_v18 = vpop.f32.mrf.mxu0 }
  0xab   :  { %v86_v19 = vadd.f32 %v116_v17, %v85_v18 }
  0xad   :  { %88 = vst [vmem:[#allocation7] sm:$0xff] %v86_v19 }
  0xae   :  { %92 = vsyncadd [#allocation4], 96  ;;  %s95_s28 = sshll.u32 %s243_s3, 4  ;;  %s201_s29 = smov [#allocation7]   ;;  %s96_s28 = int_to_ptr.hbm [resolvable:$true] %s95_s28 }
  0xaf   :  { %s93_s30 = sshll.u32 %s201_s29, 4  ;;  %s94_s30 = int_to_ptr.vmem [resolvable:$true] %s93_s30 }
  0xb0   :  { %101 = dma.vmem_to_hbm [thread:$0]  %s94_s30, 32, %s96_s28, [#allocation4], %s196_s20, %s196_s20, %s197_s21  }
  0xb1   :  { %193 = dma.done.wait [#allocation4], 128  }
  0xb2   :  { %194 = vsyncadd [#allocation4], 4294967168 }
  0xb3   :  { %106 = vsyncpa [#allocation3], 1 }
  0xb4   :  { %107 = vsyncpa [#allocation6], 1 }
  0xb5   :  { %108 = vsyncpa [#allocation4], 1 }

</bundles_post_ra>
